<compile_context>
chip_gen: v6e
topology: v6e:2x2x1
jax: 0.10.0
libtpu: 0.0.40
codegen_flags: <defaults>
</compile_context>

<pallas_src>
import functools

import numpy as np
import jax
import jax.numpy as jnp
from jax import lax
from jax.experimental import pallas as pl
from jax.experimental.pallas import tpu as pltpu

# ---- model hyper-parameters (small, consistent with the module) -------------
N_DATA = 3          # data wires (input features)
N_EXTRA = 2         # extra "learning" wires
N_WIRES = N_DATA + N_EXTRA
N_LAYERS = 2
DIM = 2 ** N_WIRES          # 32 : full statevector dimension
OUT = 2 ** N_DATA           # 8  : probs over data wires
SCALER = float(np.pi)
WSCALER = 0.1
BATCH = 8


# ------------------------------- Pallas kernel -------------------------------
def qgraph_kernel(x_ref, ur_ref, marg_ref, o_ref, *, n_data, scaler):
    """x: (B, n_data) angles; ur: (2^n_data, 2^n_wires) = U^T[kept_rows, :];
    marg: (2^n_wires, 2^n_data) marginalization matrix; o: (B, 2^n_data)."""
    kdim = 2 ** n_data

    x = x_ref[...].astype(jnp.float32)                # (B, n_data)
    b = x.shape[0]

    # RX(theta)|0> = cos(theta/2)|0> - i sin(theta/2)|1>,  theta = scaler * x
    half = x * (scaler * 0.5)
    c = jnp.cos(half)                                 # (B, n_data)
    s = jnp.sin(half)                                 # (B, n_data)

    # Compact embedded state over the data wires only (extra wires stay |0>,
    # so only these 2^n_data amplitudes of the full register are nonzero).
    # PennyLane convention: wire 0 is the most-significant bit.
    idx = lax.broadcasted_iota(jnp.int32, (b, kdim), 1)
    mag = jnp.ones((b, kdim), jnp.float32)
    nbits = jnp.zeros((b, kdim), jnp.int32)
    for w in range(n_data):
        bit = jnp.right_shift(idx, n_data - 1 - w) & 1
        mag = mag * jnp.where(bit == 1, s[:, w:w + 1], c[:, w:w + 1])
        nbits = nbits + bit

    # phase factor (-i)^k, k = number of data-wire bits set to 1
    km = nbits & 3
    re_f = jnp.where(km == 0, 1.0, jnp.where(km == 2, -1.0, 0.0))
    im_f = jnp.where(km == 1, -1.0, jnp.where(km == 3, 1.0, 0.0))

    # Fused real/imag contraction: stack along the sublane (batch) axis and do
    # a single MXU matmul; B is a multiple of 8 so the split below is free.
    psi = jnp.concatenate([mag * re_f, mag * im_f], axis=0)        # (2B, kdim)
    amp = jnp.dot(psi, ur_ref[...], preferred_element_type=jnp.float32)  # (2B, dim)
    amp_re = amp[:b]
    amp_im = amp[b:]

    p_full = amp_re * amp_re + amp_im * amp_im        # (B, dim) probabilities

    # Marginalize over the extra wires with the host-precomputed matrix.
    o_ref[...] = jnp.dot(p_full, marg_ref[...], preferred_element_type=jnp.float32)


def qgraph_forward(x, ur, marg):
    """x: (B, n_data) float32 angles; ur: (OUT, DIM) sliced U^T; marg: (DIM, OUT)."""
    b, nd = x.shape
    kdim, dim = ur.shape
    out = marg.shape[1]

    kernel = functools.partial(qgraph_kernel, n_data=nd, scaler=SCALER)
    cost = pl.CostEstimate(
        flops=2 * (2 * b) * kdim * dim + 2 * b * dim * out + 6 * b * dim,
        transcendentals=2 * b * nd,
        bytes_accessed=4 * (b * nd + kdim * dim + dim * out + b * out),
    )
    return pl.pallas_call(
        kernel,
        out_shape=jax.ShapeDtypeStruct((b, out), jnp.float32),
        grid=(1,),
        in_specs=[
            pl.BlockSpec((b, nd), lambda i: (0, 0)),
            pl.BlockSpec((kdim, dim), lambda i: (0, 0)),
            pl.BlockSpec((dim, out), lambda i: (0, 0)),
        ],
        out_specs=pl.BlockSpec((b, out), lambda i: (0, 0)),
        compiler_params=pltpu.CompilerParams(
            dimension_semantics=("arbitrary",)),
        cost_estimate=cost,
    )(x, ur, marg)


# -------------------- parameter setup glue (plain numpy) ---------------------
def build_entangler_unitary(weights, n_wires):
    """BasicEntanglerLayers(weights, rotation=RY): per-layer RY on every wire,
    followed by a ring of CNOTs (single CNOT when n_wires == 2). Real unitary."""
    dim = 2 ** n_wires
    ident2 = np.eye(2)

    def ry(t):
        ch, sh = np.cos(t / 2.0), np.sin(t / 2.0)
        return np.array([[ch, -sh], [sh, ch]])

    def single(gate, wire):
        m = np.array([[1.0]])
        for w in range(n_wires):
            m = np.kron(m, gate if w == wire else ident2)
        return m

    def cnot(control, target):
        u = np.zeros((dim, dim))
        for col in range(dim):
            cbit = (col >> (n_wires - 1 - control)) & 1
            row = col ^ (1 << (n_wires - 1 - target)) if cbit else col
            u[row, col] = 1.0
        return u

    u_total = np.eye(dim)
    for layer in range(weights.shape[0]):
        for w in range(n_wires):
            u_total = single(ry(weights[layer, w]), w) @ u_total
        if n_wires == 2:
            u_total = cnot(0, 1) @ u_total
        elif n_wires > 2:
            for w in range(n_wires):
                u_total = cnot(w, (w + 1) % n_wires) @ u_total
    return u_total.astype(np.float32)


def prepare_circuit_constants(u_circ, n_data, n_extra):
    """One-time host-side setup: slice U^T to the 2^n_data nonzero-amplitude
    rows (extra wires in |0>) and build the marginalization matrix."""
    n_wires = n_data + n_extra
    dim = 2 ** n_wires
    out = 2 ** n_data
    kept = np.arange(out) * (2 ** n_extra)                    # basis idx with extra bits = 0
    ur = np.ascontiguousarray(u_circ.T[kept, :]).astype(np.float32)   # (out, dim)
    rows = np.arange(dim)[:, None]
    cols = np.arange(out)[None, :]
    marg = ((rows >> n_extra) == cols).astype(np.float32)     # (dim, out)
    return jnp.asarray(ur), jnp.asarray(marg)


def reference_forward(x_np, u_circ, n_data, n_extra, scaler):
    """Pure numpy statevector reference (matches PennyLane semantics)."""
    n_wires = n_data + n_extra
    batch = x_np.shape[0]
    probs = np.zeros((batch, 2 ** n_data), dtype=np.float64)
    for bi in range(batch):
        psi = np.array([1.0 + 0j])
        for w in range(n_wires):
            if w < n_data:
                t = x_np[bi, w] * scaler
                q = np.array([np.cos(t / 2.0), -1j * np.sin(t / 2.0)])
            else:
                q = np.array([1.0 + 0j, 0.0 + 0j])
            psi = np.kron(psi, q)
        amp = u_circ.astype(np.float64) @ psi
        p = np.abs(amp) ** 2
        probs[bi] = p.reshape(2 ** n_data, 2 ** n_extra).sum(-1)
    return probs


# ----------------------------------- main ------------------------------------
if __name__ == "__main__":
    key = jax.random.PRNGKey(0)
    kx, kw = jax.random.split(key)

    x = jax.random.uniform(kx, (BATCH, N_DATA), dtype=jnp.float32)
    # deterministic trainable weights (BasicEntanglerLayers shape = (L, n_wires))
    weights = np.asarray(
        jax.random.uniform(kw, (N_LAYERS, N_WIRES), dtype=jnp.float32)) * WSCALER

    u_circ = build_entangler_unitary(weights, N_WIRES)
    ur, marg = prepare_circuit_constants(u_circ, N_DATA, N_EXTRA)

    probs = qgraph_forward(x, ur, marg)
    probs = jax.block_until_ready(probs)

    ref = reference_forward(np.asarray(x), u_circ, N_DATA, N_EXTRA, SCALER)
    np.testing.assert_allclose(np.asarray(probs), ref, rtol=1e-4, atol=2e-5)
    np.testing.assert_allclose(np.asarray(probs).sum(-1), 1.0, atol=1e-4)

    print("KERNEL_OK")
</pallas_src>

<mosaic_0001>
module attributes {stable_mosaic.version = 11 : i64} {
  func.func @qgraph_kernel(%arg0: i32, %arg1: memref<8x3xf32, #tpu.memory_space<vmem>>, %arg2: memref<8x32xf32, #tpu.memory_space<vmem>>, %arg3: memref<32x8xf32, #tpu.memory_space<vmem>>, %arg4: memref<8x8xf32, #tpu.memory_space<vmem>>) attributes {dimension_semantics = [#tpu.dimension_semantics<arbitrary>], iteration_bounds = array<i64: 1>, scalar_prefetch = 0 : i64, scratch_operands = 0 : i64, tpu.core_type = #tpu.core_type<tc>, window_params = [{pipeline_mode = #tpu.pipeline_mode<synchronous>, transform_indices = @transform_0, window_bounds = array<i64: 8, 3>}, {pipeline_mode = #tpu.pipeline_mode<synchronous>, transform_indices = @transform_1, window_bounds = array<i64: 8, 32>}, {pipeline_mode = #tpu.pipeline_mode<synchronous>, transform_indices = @transform_2, window_bounds = array<i64: 32, 8>}, {pipeline_mode = #tpu.pipeline_mode<synchronous>, transform_indices = @transform_3, window_bounds = array<i64: 8, 8>}]} {
    %c0 = arith.constant 0 : index
    %c0_0 = arith.constant 0 : index
    %0 = vector.load %arg1[%c0, %c0_0] : memref<8x3xf32, #tpu.memory_space<vmem>>, vector<8x3xf32>
    %cst = arith.constant 1.57079637 : f32
    %1 = vector.broadcast %cst : f32 to vector<8x3xf32>
    %2 = arith.mulf %0, %1 : vector<8x3xf32>
    %3 = math.cos %2 : vector<8x3xf32>
    %4 = math.sin %2 : vector<8x3xf32>
    %5 = tpu.iota {dimensions = array<i32: 1>} : vector<8x8xi32>
    %cst_1 = arith.constant 1.000000e+00 : f32
    %6 = vector.broadcast %cst_1 : f32 to vector<8x8xf32>
    %c0_i32 = arith.constant 0 : i32
    %7 = vector.broadcast %c0_i32 : i32 to vector<8x8xi32>
    %c2_i32 = arith.constant 2 : i32
    %8 = vector.broadcast %c2_i32 : i32 to vector<8x8xi32>
    %9 = arith.shrsi %5, %8 : vector<8x8xi32>
    %c1_i32 = arith.constant 1 : i32
    %10 = vector.broadcast %c1_i32 : i32 to vector<8x8xi32>
    %11 = arith.andi %9, %10 : vector<8x8xi32>
    %c1_i32_2 = arith.constant 1 : i32
    %12 = vector.broadcast %c1_i32_2 : i32 to vector<8x8xi32>
    %13 = arith.cmpi eq, %11, %12 : vector<8x8xi32>
    %14 = vector.extract_strided_slice %4 {offsets = [0, 0], sizes = [8, 1], strides = [1, 1]} : vector<8x3xf32> to vector<8x1xf32>
    %15 = vector.extract_strided_slice %3 {offsets = [0, 0], sizes = [8, 1], strides = [1, 1]} : vector<8x3xf32> to vector<8x1xf32>
    %16 = vector.shape_cast %14 : vector<8x1xf32> to vector<8x1xf32>
    %17 = vector.broadcast %16 : vector<8x1xf32> to vector<8x8xf32>
    %18 = vector.shape_cast %15 : vector<8x1xf32> to vector<8x1xf32>
    %19 = vector.broadcast %18 : vector<8x1xf32> to vector<8x8xf32>
    %20 = arith.select %13, %17, %19 : vector<8x8xi1>, vector<8x8xf32>
    %21 = arith.mulf %6, %20 : vector<8x8xf32>
    %22 = arith.addi %7, %11 : vector<8x8xi32>
    %c1_i32_3 = arith.constant 1 : i32
    %23 = vector.broadcast %c1_i32_3 : i32 to vector<8x8xi32>
    %24 = arith.shrsi %5, %23 : vector<8x8xi32>
    %c1_i32_4 = arith.constant 1 : i32
    %25 = vector.broadcast %c1_i32_4 : i32 to vector<8x8xi32>
    %26 = arith.andi %24, %25 : vector<8x8xi32>
    %c1_i32_5 = arith.constant 1 : i32
    %27 = vector.broadcast %c1_i32_5 : i32 to vector<8x8xi32>
    %28 = arith.cmpi eq, %26, %27 : vector<8x8xi32>
    %29 = vector.extract_strided_slice %4 {offsets = [0, 1], sizes = [8, 1], strides = [1, 1]} : vector<8x3xf32> to vector<8x1xf32>
    %30 = vector.extract_strided_slice %3 {offsets = [0, 1], sizes = [8, 1], strides = [1, 1]} : vector<8x3xf32> to vector<8x1xf32>
    %31 = vector.shape_cast %29 : vector<8x1xf32> to vector<8x1xf32>
    %32 = vector.broadcast %31 : vector<8x1xf32> to vector<8x8xf32>
    %33 = vector.shape_cast %30 : vector<8x1xf32> to vector<8x1xf32>
    %34 = vector.broadcast %33 : vector<8x1xf32> to vector<8x8xf32>
    %35 = arith.select %28, %32, %34 : vector<8x8xi1>, vector<8x8xf32>
    %36 = arith.mulf %21, %35 : vector<8x8xf32>
    %37 = arith.addi %22, %26 : vector<8x8xi32>
    %c0_i32_6 = arith.constant 0 : i32
    %38 = vector.broadcast %c0_i32_6 : i32 to vector<8x8xi32>
    %39 = arith.shrsi %5, %38 : vector<8x8xi32>
    %c1_i32_7 = arith.constant 1 : i32
    %40 = vector.broadcast %c1_i32_7 : i32 to vector<8x8xi32>
    %41 = arith.andi %39, %40 : vector<8x8xi32>
    %c1_i32_8 = arith.constant 1 : i32
    %42 = vector.broadcast %c1_i32_8 : i32 to vector<8x8xi32>
    %43 = arith.cmpi eq, %41, %42 : vector<8x8xi32>
    %44 = vector.extract_strided_slice %4 {offsets = [0, 2], sizes = [8, 1], strides = [1, 1]} : vector<8x3xf32> to vector<8x1xf32>
    %45 = vector.extract_strided_slice %3 {offsets = [0, 2], sizes = [8, 1], strides = [1, 1]} : vector<8x3xf32> to vector<8x1xf32>
    %46 = vector.shape_cast %44 : vector<8x1xf32> to vector<8x1xf32>
    %47 = vector.broadcast %46 : vector<8x1xf32> to vector<8x8xf32>
    %48 = vector.shape_cast %45 : vector<8x1xf32> to vector<8x1xf32>
    %49 = vector.broadcast %48 : vector<8x1xf32> to vector<8x8xf32>
    %50 = arith.select %43, %47, %49 : vector<8x8xi1>, vector<8x8xf32>
    %51 = arith.mulf %36, %50 : vector<8x8xf32>
    %52 = arith.addi %37, %41 : vector<8x8xi32>
    %c3_i32 = arith.constant 3 : i32
    %53 = vector.broadcast %c3_i32 : i32 to vector<8x8xi32>
    %54 = arith.andi %52, %53 : vector<8x8xi32>
    %c0_i32_9 = arith.constant 0 : i32
    %55 = vector.broadcast %c0_i32_9 : i32 to vector<8x8xi32>
    %56 = arith.cmpi eq, %54, %55 : vector<8x8xi32>
    %c2_i32_10 = arith.constant 2 : i32
    %57 = vector.broadcast %c2_i32_10 : i32 to vector<8x8xi32>
    %58 = arith.cmpi eq, %54, %57 : vector<8x8xi32>
    %cst_11 = arith.constant -1.000000e+00 : f32
    %cst_12 = arith.constant 0.000000e+00 : f32
    %59 = vector.broadcast %cst_11 : f32 to vector<8x8xf32>
    %60 = vector.broadcast %cst_12 : f32 to vector<8x8xf32>
    %61 = arith.select %58, %59, %60 : vector<8x8xi1>, vector<8x8xf32>
    %cst_13 = arith.constant 1.000000e+00 : f32
    %62 = vector.broadcast %cst_13 : f32 to vector<8x8xf32>
    %63 = arith.select %56, %62, %61 : vector<8x8xi1>, vector<8x8xf32>
    %c1_i32_14 = arith.constant 1 : i32
    %64 = vector.broadcast %c1_i32_14 : i32 to vector<8x8xi32>
    %65 = arith.cmpi eq, %54, %64 : vector<8x8xi32>
    %c3_i32_15 = arith.constant 3 : i32
    %66 = vector.broadcast %c3_i32_15 : i32 to vector<8x8xi32>
    %67 = arith.cmpi eq, %54, %66 : vector<8x8xi32>
    %cst_16 = arith.constant 1.000000e+00 : f32
    %cst_17 = arith.constant 0.000000e+00 : f32
    %68 = vector.broadcast %cst_16 : f32 to vector<8x8xf32>
    %69 = vector.broadcast %cst_17 : f32 to vector<8x8xf32>
    %70 = arith.select %67, %68, %69 : vector<8x8xi1>, vector<8x8xf32>
    %cst_18 = arith.constant -1.000000e+00 : f32
    %71 = vector.broadcast %cst_18 : f32 to vector<8x8xf32>
    %72 = arith.select %65, %71, %70 : vector<8x8xi1>, vector<8x8xf32>
    %73 = arith.mulf %51, %63 : vector<8x8xf32>
    %74 = arith.mulf %51, %72 : vector<8x8xf32>
    %75 = tpu.concatenate %73, %74 in 0 : vector<8x8xf32>, vector<8x8xf32> -> vector<16x8xf32>
    %c0_19 = arith.constant 0 : index
    %c0_20 = arith.constant 0 : index
    %76 = vector.load %arg2[%c0_19, %c0_20] : memref<8x32xf32, #tpu.memory_space<vmem>>, vector<8x32xf32>
    %cst_21 = arith.constant dense<0.000000e+00> : vector<16x32xf32>
    %77 = tpu.matmul %75, %76, %cst_21 {dimension_numbers = #tpu.dot_dimension_numbers<[1], [0], [0], [1], [0, 0, 1, 1], [], []>} : vector<16x8xf32>, vector<8x32xf32>, vector<16x32xf32> -> vector<16x32xf32>
    %78 = vector.extract_strided_slice %77 {offsets = [0, 0], sizes = [8, 32], strides = [1, 1]} : vector<16x32xf32> to vector<8x32xf32>
    %79 = vector.extract_strided_slice %77 {offsets = [8, 0], sizes = [8, 32], strides = [1, 1]} : vector<16x32xf32> to vector<8x32xf32>
    %80 = arith.mulf %78, %78 : vector<8x32xf32>
    %81 = arith.mulf %79, %79 : vector<8x32xf32>
    %82 = arith.addf %80, %81 : vector<8x32xf32>
    %c0_22 = arith.constant 0 : index
    %c0_23 = arith.constant 0 : index
    %83 = vector.load %arg3[%c0_22, %c0_23] : memref<32x8xf32, #tpu.memory_space<vmem>>, vector<32x8xf32>
    %cst_24 = arith.constant dense<0.000000e+00> : vector<8x8xf32>
    %84 = tpu.matmul %82, %83, %cst_24 {dimension_numbers = #tpu.dot_dimension_numbers<[1], [0], [0], [1], [0, 0, 1, 1], [], []>} : vector<8x32xf32>, vector<32x8xf32>, vector<8x8xf32> -> vector<8x8xf32>
    %c0_25 = arith.constant 0 : index
    %c0_26 = arith.constant 0 : index
    %85 = vector.load %arg4[%c0_25, %c0_26] : memref<8x8xf32, #tpu.memory_space<vmem>>, vector<8x8xf32>
    tpu.vector_store %arg4[%c0_25, %c0_26], %84 {strides = array<i32>} : memref<8x8xf32, #tpu.memory_space<vmem>>, vector<8x8xf32>,
    return
  }
  func.func @transform_0(%arg0: i32) -> (i32, i32) {
    %c0_i32 = arith.constant 0 : i32
    %c0_i32_0 = arith.constant 0 : i32
    %c0_i32_1 = arith.constant 0 : i32
    return %c0_i32, %c0_i32_0 : i32, i32
  }
  func.func @transform_1(%arg0: i32) -> (i32, i32) {
    %c0_i32 = arith.constant 0 : i32
    %c0_i32_0 = arith.constant 0 : i32
    %c0_i32_1 = arith.constant 0 : i32
    return %c0_i32, %c0_i32_0 : i32, i32
  }
  func.func @transform_2(%arg0: i32) -> (i32, i32) {
    %c0_i32 = arith.constant 0 : i32
    %c0_i32_0 = arith.constant 0 : i32
    %c0_i32_1 = arith.constant 0 : i32
    return %c0_i32, %c0_i32_0 : i32, i32
  }
  func.func @transform_3(%arg0: i32) -> (i32, i32) {
    %c0_i32 = arith.constant 0 : i32
    %c0_i32_0 = arith.constant 0 : i32
    %c0_i32_1 = arith.constant 0 : i32
    return %c0_i32, %c0_i32_0 : i32, i32
  }
}

</mosaic_0001>

<bundles_post_ra>
// kernel: tpu_custom_call.1
= control target key start
LH: loop header
LB: loop body
LE: loop exit
PB: predicated region body
PF: predicated region fallthrough
CT: control target
= control target key end

     0   :  { %v538_v1 = vmov 1   ;;  %v539_v2 = vmov 0   ;;  %s615_s0 = inlined_call_operand.vmem [shape: f32[8,3], index: 0, kind: input, shape index: {}]   ;;  %s616_s1 = inlined_call_operand.vmem [shape: f32[8,32], index: 1, kind: input, shape index: {}]   ;;  %s617_s2 = inlined_call_operand.vmem [shape: f32[32,8], index: 2, kind: input, shape index: {}]   ;;  %s618_s3 = inlined_call_operand.hbm [shape: f32[8,8], index: 3, kind: output, shape index: {}]  }
   0x1   :  { %v15_v0 = vld [vmem:[%s615_s0] sm:$0xff]  ;;  %509 = vset.pattern.permute.xlu1 %v538_v1  ;;  %508 = vset.pattern.permute.xlu0 %v539_v2 }
   0x2   :  { %v573_v3 = vmul.f32 1.5707964, %v15_v0 }
   0x4   :  { %v20_v4 = vand.u32 2139095040, %v573_v3 }
   0x5   :  { %8 = vsyncpa [#allocation3], 0  ;;  %v17_v6 = vand.u32 2147483647, %v573_v3  ;;  %v540_v15 = vmov 683565275   ;;  %vm109_vm15 = vweird.f32 %v573_v3 }
   0x6   :  { %v21_v5 = vshrl.u32 %v20_v4, 23  ;;  %v541_v17 = vmov 2475754826   ;;  %v542_v19 = vmov 2131351028   ;;  %vm19_vm7 = vcmp.lt.s32.totalorder %v573_v3, 0 }
   0x7   :  { %v24_v9 = vand.u32 8388607, %v17_v6  ;;  %v543_v21 = vmov 2102212464   ;;  %v544_v23 = vmov 920167782  }
   0x8   :  { %v457_v7 = vadd.s32 4294967169, %v21_v5  ;;  %v545_v30 = vmov 1326507024   ;;  %vm18_vm8 = vcmp.le.f32.partialorder %v17_v6, 0.7853982  ;;  %s549_s22 = smov [#allocation2]  }
   0x9   :  { %v25_v12 = vor.u32 8388608, %v24_v9  ;;  %s449_s23 = sshll.u32 %s549_s22, 4  ;;  %s450_s23 = int_to_ptr.vmem [resolvable:$true] %s449_s23 }
   0xa   :  { %v27_v8 = vadd.s32 1, %v457_v7  ;;  %s516_s24 = scalar_lea.vmem %s450_s23, 128  ;;  %p521_p1 = scmp.lt.s32.totalorder %s450_s23, %s450_s23 }
   0xb   :  { %v65_v32 = vshll.u32 %v25_v12, 8  ;;  %p517_p0 = scmp.ne.s32.totalorder %s450_s23, %s516_s24  ;;  %p522_p2 = scmp.lt.s32.totalorder %s516_s24, %s516_s24 }
   0xc   :  { %vm28_vm0 = vcmp.gt.s32.totalorder %v27_v8, 0 }
   0xd   :  { %v29_v10 = vsel %vm28_vm0, %v27_v8, 0  ;;  %p523_p3 = por %p522_p2, %p521_p1 }
   0xe   :  { %v31_v11 = vand.u32 31, %v29_v10  ;;  %v30_v13 = vshrl.u32 %v29_v10, 5 }
   0xf   :  { %p524_p4 = pnand %p523_p3, %p517_p0 }
  0x10   :  { %v32_v14 = vsub.s32 32, %v31_v11  ;;  %v34_v16 = vshll.u32 %v540_v15, %v31_v11  ;;  %v37_v18 = vshll.u32 %v541_v17, %v31_v11  ;;  %v40_v20 = vshll.u32 %v542_v19, %v31_v11 }
  0x11   :  { %v43_v22 = vshll.u32 %v543_v21, %v31_v11  ;;  %v46_v24 = vshll.u32 %v544_v23, %v31_v11  ;;  %vm49_vm1 = vcmp.lt.s32.totalorder %v30_v13, 1  ;;  %vm52_vm2 = vcmp.lt.s32.totalorder %v30_v13, 4 }
  0x12   :  { %v33_v25 = vshrl.u32 %v540_v15, %v32_v14  ;;  %v35_v26 = vshrl.u32 %v541_v17, %v32_v14  ;;  %v38_v27 = vshrl.u32 %v542_v19, %v32_v14  ;;  %v41_v28 = vshrl.u32 %v543_v21, %v32_v14 }
  0x13   :  { %v44_v29 = vshrl.u32 %v544_v23, %v32_v14  ;;  %v47_v31 = vshrl.u32 %v545_v30, %v32_v14  ;;  %vm50_vm3 = vcmp.lt.s32.totalorder %v30_v13, 2  ;;  %vm51_vm4 = vcmp.lt.s32.totalorder %v30_v13, 3 }
  0x14   :  { %v36_v33 = vor.u32 %v35_v26, %v34_v16  ;;  %v39_v34 = vor.u32 %v38_v27, %v37_v18  ;;  %v42_v35 = vor.u32 %v41_v28, %v40_v20 }
  0x15   :  { %v45_v36 = vor.u32 %v44_v29, %v43_v22  ;;  %v48_v37 = vor.u32 %v47_v31, %v46_v24 }
  0x16   :  { %v53_v38 = vsel %vm49_vm1, %v33_v25, %v36_v33  ;;  %v54_v39 = vsel %vm52_vm2, %v42_v35, 2102212464  ;;  %v57_v40 = vsel %vm49_vm1, %v36_v33, %v39_v34  ;;  %v61_v41 = vsel %vm49_vm1, %v39_v34, %v42_v35 }
  0x17   :  { %v55_v42 = vsel %vm51_vm4, %v39_v34, %v54_v39  ;;  %v58_v43 = vsel %vm52_vm2, %v45_v36, 920167782  ;;  %v62_v44 = vsel %vm52_vm2, %v48_v37, 1326507024  ;;  %v546_v37 = vmov 0.0  }
  0x18   :  { %v59_v45 = vsel %vm51_vm4, %v42_v35, %v58_v43  ;;  %v63_v46 = vsel %vm51_vm4, %v45_v36, %v62_v44  ;;  %v56_v47 = vsel %vm50_vm3, %v53_v38, %v55_v42  ;;  %481 = vmatprep.subr.mxu1 %v546_v37  ;;  %v547_v38 = vmov 2  }
  0x19   :  { %v60_v48 = vsel %vm50_vm3, %v57_v40, %v59_v45  ;;  %v64_v49 = vsel %vm50_vm3, %v61_v41, %v63_v46  ;;  %v72_v54 = vmul.u32 %v65_v32, %v56_v47  ;;  %v224_v39 = vlaneseq }
  0x1a   :  { %v579_v50 = vmul.u32.u64.low %v65_v32, %v64_v49  ;;  %v580_v51 = vmul.u32.u64.high %v65_v32, %v64_v49, %v579_v50  ;;  %v582_v52 = vmul.u32.u64.low %v65_v32, %v60_v48  ;;  %v583_v53 = vmul.u32.u64.high %v65_v32, %v60_v48, %v582_v52 }
  0x1b   :  { %v225_v40 = vand.u32 127, %v224_v39 }
  0x1c   :  { %vm74_vm5 = vc.u32 %v580_v51, %v582_v52  ;;  %v75_v55 = vadd.s32 1, %v583_v53  ;;  %v73_v2 = vadd.s32 %v582_v52, %v580_v51 }
  0x1d   :  { %v240_v41 = vshra.s32 %v225_v40, 1  ;;  %v226_v42 = vshra.s32 %v225_v40, 2  ;;  %v254_v46 = vand.u32 1, %v225_v40 }
  0x1e   :  { %v76_v56 = vsel %vm74_vm5, %v75_v55, %v583_v53 }
  0x1f   :  { %v77_v57 = vadd.s32 %v76_v56, %v72_v54  ;;  %v241_v43 = vand.u32 1, %v240_v41  ;;  %v227_v44 = vand.u32 1, %v226_v42  ;;  %vm255_vm4 = vcmp.eq.s32.totalorder %v254_v46, 1 }
  0x21   :  { %v78_v58 = vadd.s32 536870912, %v77_v57  ;;  %v253_v45 = vadd.s32 %v241_v43, %v227_v44  ;;  %vm242_vm0 = vcmp.eq.s32.totalorder %v241_v43, 1  ;;  %vm228_vm1 = vcmp.eq.s32.totalorder %v227_v44, 1 }
  0x23   :  { %v79_v59 = vshrl.u32 %v78_v58, 30  ;;  %v266_v47 = vadd.s32 %v254_v46, %v253_v45 }
  0x25   :  { %v80_v60 = vshll.u32 %v79_v59, 30  ;;  %v103_v17 = vsub.s32 4, %v79_v59  ;;  %v267_v50 = vand.u32 3, %v266_v47 }
  0x27   :  { %v81_v61 = vsub.s32 %v77_v57, %v80_v60  ;;  %v104_v20 = vsel %vm19_vm7, %v103_v17, %v79_v59  ;;  %vm273_vm2 = vcmp.eq.s32.totalorder %v267_v50, 3  ;;  %vm269_vm3 = vcmp.eq.s32.totalorder %v267_v50, 2 }
  0x28   :  { %v106_v22 = vsel %vm18_vm8, 0, %v104_v20  ;;  %vm272_vm5 = vcmp.eq.s32.totalorder %v267_v50, 1  ;;  %v274_v55 = vsel %vm273_vm2, 1.0, %v546_v37  ;;  %v270_v56 = vsel %vm269_vm3, -1.0, %v546_v37 }
  0x29   :  { %v83_v62 = vsub.s32 0, %v81_v61  ;;  %v213_v23 = vadd.s32 3, %v106_v22  ;;  %v110_v25 = vand.u32 3, %v106_v22  ;;  %v275_v60 = vsel %vm272_vm5, -1.0, %v274_v55 }
  0x2b   :  { %v458_v63 = vmin.u32 %v83_v62, %v81_v61  ;;  %v214_v24 = vand.u32 3, %v213_v23  ;;  %vm115_vm10 = vcmp.eq.s32.totalorder %v110_v25, 2  ;;  %vm112_vm12 = vcmp.eq.s32.totalorder %v110_v25, 0 }
  0x2c   :  { %vm111_vm14 = vcmp.lt.s32.totalorder %v110_v25, 2 }
  0x2d   :  { %v85_v0 = vclz %v458_v63  ;;  %vm219_vm9 = vcmp.eq.s32.totalorder %v214_v24, 2  ;;  %vm216_vm11 = vcmp.eq.s32.totalorder %v214_v24, 0  ;;  %vm215_vm13 = vcmp.lt.s32.totalorder %v214_v24, 2 }
  0x2f   :  { %v459_v1 = vadd.s32 4294967294, %v85_v0 }
  0x31   :  { %vm460_vm6 = vcmp.lt.s32.totalorder %v459_v1, 0 }
  0x32   :  { %v88_v4 = vsel %vm460_vm6, 0, %v459_v1  ;;  %vm268_vm6 = vcmp.eq.s32.totalorder %v267_v50, 0 }
  0x33   :  { %v89_v5 = vsub.s32 32, %v88_v4  ;;  %v90_v7 = vshll.u32 %v81_v61, %v88_v4  ;;  %v93_v8 = vsub.s32 4294967266, %v88_v4  ;;  %v271_v62 = vsel %vm268_vm6, 1.0, %v270_v56  ;;  %v366_v4 = vld [vmem:[%s617_s2 + $0x10] sm:$0xff] }
  0x35   :  { %v91_v9 = vshrl.u32 %v73_v2, %v89_v5  ;;  %v94_v10 = vadd.s32 127, %v93_v8  ;;  %v367_v2 = vld [vmem:[%s617_s2 + $0x18] sm:$0xff]  ;;  %v365_v5 = vld [vmem:[%s617_s2 + $0x8] sm:$0xff] }
  0x36   :  { %482 = vmatpush3.msra.mxu1 %v367_v2 }
  0x37   :  { %v92_v11 = vor.u32 %v91_v9, %v90_v7  ;;  %v95_v12 = vshll.u32 %v94_v10, 23  ;;  %483 = vmatprep.subr.mxu1 %v546_v37  ;;  %v364_v7 = vld [vmem:[%s617_s2] sm:$0xff] }
  0x38   :  { %484 = vmatpush3.msra.mxu1 %v366_v4 }
  0x39   :  { %v96_v13 = vor.u32 4788187, %v95_v12  ;;  %v99_v14 = vcvt.s32.f32 %v92_v11  ;;  %485 = vmatprep.subr.mxu1 %v546_v37 }
  0x3a   :  { %486 = vmatpush3.msra.mxu1 %v365_v5 }
  0x3b   :  { %v97_v15 = vand.u32 2147483647, %v96_v13  ;;  %487 = vmatprep.subr.mxu1 %v546_v37 }
  0x3c   :  { %488 = vmatpush3.msra.mxu1 %v364_v7 }
  0x3d   :  { %v100_v16 = vmul.f32 %v99_v14, %v97_v15 }
  0x3f   :  { %v101_v18 = vxor.u32 2147483648, %v100_v16 }
  0x41   :  { %v102_v19 = vsel %vm19_vm7, %v101_v18, %v100_v16  ;;  %vm279_vm7 = vcmask 64512  }
  0x42   :  { %v105_v21 = vsel %vm18_vm8, %v573_v3, %v102_v19  ;;  %v278_v3 = vld [vmem:[%s616_s1] sm:$0xff]  ;;  %vm548_vm8 = vmmov 0  }
  0x43   :  { %512 = vcosq.f32 %v105_v21  ;;  %476 = vmatprep.subr.mxu0 %v278_v3  ;;  %489 = vmatprep.mubr.msk.f32.mxu1 %vm548_vm8, %v546_v37 }
  0x44   :  { %514 = vsinq.f32 %v105_v21  ;;  %477 = vmatpush3.msra.mxu0 %v278_v3 }
  0x50   :  { %v513_v26 = vpop.eup %512 }
  0x51   :  { %v515_v27 = vpop.eup %514  ;;  %v116_v28 = vxor.u32 2147483648, %v513_v26 }
  0x52   :  { %v113_v29 = vxor.u32 2147483648, %v515_v27 }
  0x53   :  { %v221_v6 = vsel %vm219_vm9, %v116_v28, %v515_v27  ;;  %v117_v30 = vsel %vm115_vm10, %v116_v28, %v515_v27  ;;  %vm368_vm9 = vcmask 261120  }
  0x54   :  { %v218_v31 = vsel %vm216_vm11, %v513_v26, %v113_v29  ;;  %v114_v32 = vsel %vm112_vm12, %v513_v26, %v113_v29 }
  0x55   :  { %v222_v33 = vsel %vm215_vm13, %v218_v31, %v221_v6  ;;  %v118_v34 = vsel %vm111_vm14, %v114_v32, %v117_v30 }
  0x56   :  { %v223_v35 = vsel %vm109_vm15, nan, %v222_v33  ;;  %v119_v36 = vsel %vm109_vm15, nan, %v118_v34 }
  0x57   :  { %244 = vperm.xlu1 %509, %v223_v35   ;;  %231 = vperm.xlu0 %508, %v223_v35  }
  0x5b   :  { %248 = vperm.xlu1 %509, %v119_v36   ;;  %236 = vperm.xlu0 %508, %v119_v36  }
  0x5f   :  { %511 = vset.pattern.permute.xlu1 %v547_v38  ;;  %510 = vset.pattern.permute.xlu0 %v547_v38 }
  0x60   :  { %261 = vperm.xlu1 %511, %v119_v36   ;;  %257 = vperm.xlu0 %510, %v223_v35  }
  0xd2   :  { %v245_v48 = vpop.permute.xlu1 %244  ;;  %v232_v49 = vpop.permute.xlu0 %231 }
  0xd6   :  { %v249_v51 = vpop.permute.xlu1 %248  ;;  %v237_v52 = vpop.permute.xlu0 %236 }
  0xd7   :  { %v251_v53 = vsel %vm242_vm0, %v245_v48, %v249_v51  ;;  %v239_v54 = vsel %vm228_vm1, %v232_v49, %v237_v52 }
  0xd8   :  { %v252_v57 = vmul.f32 %v251_v53, %v239_v54 }
  0xdb   :  { %v262_v58 = vpop.permute.xlu1 %261  ;;  %v258_v59 = vpop.permute.xlu0 %257 }
  0xdc   :  { %v264_v61 = vsel %vm255_vm4, %v258_v59, %v262_v58 }
  0xdd   :  { %v265_v63 = vmul.f32 %v264_v61, %v252_v57 }
  0xdf   :  { %v277_v0 = vmul.f32 %v275_v60, %v265_v63  ;;  %v276_v1 = vmul.f32 %v271_v62, %v265_v63 }
  0xe1   :  { %478 = vmatprep.mubr.msk.f32.mxu0 %vm279_vm7, %v276_v1 }
  0xe2   :  { %479 = vmatmul.mubr.msk.f32.vlgmr.msra.gmra.mxu0 %vm279_vm7, %v277_v0 }
 0x1a2   :  { %v480_v8 = vpop.f32.mrf.mxu0 }
 0x1a3   :  { %v362_v10 = vmul.f32 %v480_v8, %v480_v8 }
 0x1a4   :  { %v352_v9 = vpop.f32.mrf.mxu0 }
 0x1a5   :  { %v361_v11 = vmul.f32 %v352_v9, %v352_v9 }
 0x1a7   :  { %v363_v12 = vadd.f32 %v362_v10, %v361_v11 }
 0x1a9   :  { %490 = vmatmul.mubr.msk.f32.vlgmr.msra.gmra.mxu1 %vm368_vm9, %v363_v12 }
 0x269   :  { %v438_v13 = vpop.f32.mrf.mxu1 }
 0x26a   :  { %442 = vst.msk [vmem:[#allocation2] sm:$0xff] %vm279_vm7, %v438_v13 }
 0x26b   :  { %v491_v14 = vpop.f32.mrf.mxu1 }
 0x26c   :  { %527 = shalt.err (!%p524_p4)
}
 0x26d   :  { %452 = dma.vmem_to_hbm [thread:$0]  %s450_s23, 128, %s618_s3, [#allocation3]  }
 0x26e   :  { %536 = dma.done.wait [#allocation3], 128  }
 0x26f   :  { %537 = vsyncadd [#allocation3], 4294967168 }
 0x270   :  { %456 = vsyncpa [#allocation3], 1 }

</bundles_post_ra>
